<compile_context>
chip_gen: v5e
topology: v5e:2x2
jax: 0.10.0
libtpu: 0.0.40
codegen_flags: <defaults>
</compile_context>

<pallas_src>
import functools

import jax
import jax.numpy as jnp
from jax.experimental import pallas as pl
from jax.experimental.pallas import tpu as pltpu


def _round_up(x, m):
    return (x + m - 1) // m * m


def _mlp_kernel(x_ref, w1_ref, b1_ref, w2_ref, b2_ref, w3_ref, b3_ref, o_ref):
    # layer1 + ReLU (bf16 operands, f32 accumulation)
    h1 = jnp.dot(x_ref[...], w1_ref[...], preferred_element_type=jnp.float32)
    h1 = jnp.maximum(h1 + b1_ref[...], 0.0).astype(jnp.bfloat16)
    # layer2 + ReLU
    h2 = jnp.dot(h1, w2_ref[...], preferred_element_type=jnp.float32)
    h2 = jnp.maximum(h2 + b2_ref[...], 0.0).astype(jnp.bfloat16)
    # last_layer[ds_idx] (selected + lane-padded head passed in from the wrapper)
    out = jnp.dot(h2, w3_ref[...], preferred_element_type=jnp.float32)
    o_ref[...] = (out + b3_ref[...]).astype(o_ref.dtype)


def fc2layers_forward(x, params, ds_idx=0, tile_n=256):
    """Forward pass of FC2Layers.

    x: any shape whose trailing dims flatten to input_size (e.g. NCHW).
    params: dict with w1,b1,w2,b2 and per-dataset heads w3s,b3s.
    ds_idx must be a static Python int (head selection is host-side).
    """
    w1, b1 = params["w1"], params["b1"]
    w2, b2 = params["w2"], params["b2"]
    w3, b3 = params["w3s"][ds_idx], params["b3s"][ds_idx]

    input_size = w1.shape[0]
    l1 = w1.shape[1]
    l2 = w2.shape[1]
    num_classes = w3.shape[1]

    # x.view(-1, input_size)
    x2d = x.reshape(-1, input_size)
    n = x2d.shape[0]

    # --- batch tiling: pad rows to a multiple of the tile (tile is a multiple of 8) ---
    tile_n = max(8, min(_round_up(tile_n, 8), _round_up(n, 8)))
    n_pad = _round_up(n, tile_n)
    if n_pad != n:
        x2d = jnp.pad(x2d, ((0, n_pad - n), (0, 0)))

    # --- lane-dense output: pad the selected head to a multiple of 128 columns ---
    c_pad = _round_up(num_classes, 128)
    if c_pad != num_classes:
        w3 = jnp.pad(w3, ((0, 0), (0, c_pad - num_classes)))
        b3 = jnp.pad(b3, ((0, 0), (0, c_pad - num_classes)))

    # bf16 operands for the MXU, f32 biases/accumulation.
    x_bf = x2d.astype(jnp.bfloat16)
    w1_bf = w1.astype(jnp.bfloat16)
    w2_bf = w2.astype(jnp.bfloat16)
    w3_bf = w3.astype(jnp.bfloat16)
    b1_f = b1.astype(jnp.float32)
    b2_f = b2.astype(jnp.float32)
    b3_f = b3.astype(jnp.float32)

    grid = (pl.cdiv(n_pad, tile_n),)

    # Weights/biases: constant block index -> resident in VMEM across grid steps.
    const = lambda i: (0, 0)
    in_specs = [
        pl.BlockSpec((tile_n, input_size), lambda i: (i, 0)),  # x tile
        pl.BlockSpec((input_size, l1), const),                 # w1
        pl.BlockSpec((1, l1), const),                          # b1
        pl.BlockSpec((l1, l2), const),                         # w2
        pl.BlockSpec((1, l2), const),                          # b2
        pl.BlockSpec((l2, c_pad), const),                      # w3 (padded head)
        pl.BlockSpec((1, c_pad), const),                       # b3 (padded head)
    ]
    out_specs = pl.BlockSpec((tile_n, c_pad), lambda i: (i, 0))

    out_padded = pl.pallas_call(
        _mlp_kernel,
        out_shape=jax.ShapeDtypeStruct((n_pad, c_pad), jnp.float32),
        grid=grid,
        in_specs=in_specs,
        out_specs=out_specs,
        compiler_params=pltpu.CompilerParams(
            dimension_semantics=("parallel",),
            vmem_limit_bytes=48 * 1024 * 1024,
        ),
    )(x_bf, w1_bf, b1_f, w2_bf, b2_f, w3_bf, b3_f)

    # Strip row padding and the lane padding on the classes dim.
    return out_padded[:n, :num_classes]


def init_params(key, input_size, layer1_width, layer2_width,
                num_of_classes, num_of_datasets):
    """Deterministic init mirroring nn.Linear's uniform(-1/sqrt(fan_in), +)."""
    def linear(key, fan_in, fan_out):
        kw, kb = jax.random.split(key)
        bound = 1.0 / jnp.sqrt(fan_in)
        # stored transposed: (in, out)
        w = jax.random.uniform(kw, (fan_in, fan_out), jnp.float32, -bound, bound)
        b = jax.random.uniform(kb, (1, fan_out), jnp.float32, -bound, bound)
        return w, b

    keys = jax.random.split(key, 2 + num_of_datasets)
    w1, b1 = linear(keys[0], input_size, layer1_width)
    w2, b2 = linear(keys[1], layer1_width, layer2_width)
    w3s, b3s = [], []
    for d in range(num_of_datasets):
        w3, b3 = linear(keys[2 + d], layer2_width, num_of_classes)
        w3s.append(w3)
        b3s.append(b3)
    return {"w1": w1, "b1": b1, "w2": w2, "b2": b2, "w3s": w3s, "b3s": b3s}


if __name__ == "__main__":
    # Small shapes consistent with the module: input image 1x16x16 -> input_size=256,
    # layer widths 128, 10 classes, 2 dataset heads.
    batch, chans, h, w = 4, 1, 16, 16
    input_size = chans * h * w          # 256
    layer1_width = 128
    layer2_width = 128
    num_of_classes = 10
    num_of_datasets = 2

    key = jax.random.PRNGKey(0)
    kx, kp = jax.random.split(key)
    x = jax.random.normal(kx, (batch, chans, h, w), jnp.float32)   # NCHW input
    params = init_params(kp, input_size, layer1_width, layer2_width,
                         num_of_classes, num_of_datasets)

    out = fc2layers_forward(x, params, ds_idx=0)
    out = jax.block_until_ready(out)

    # Pure-JAX reference of the same math with the same bf16 operand / f32 accumulate
    # dtype policy, so the comparison is tight.
    x2d = x.reshape(-1, input_size).astype(jnp.bfloat16)
    w1b = params["w1"].astype(jnp.bfloat16)
    w2b = params["w2"].astype(jnp.bfloat16)
    w3b = params["w3s"][0].astype(jnp.bfloat16)
    ref = jnp.maximum(
        jnp.dot(x2d, w1b, preferred_element_type=jnp.float32) + params["b1"], 0.0
    ).astype(jnp.bfloat16)
    ref = jnp.maximum(
        jnp.dot(ref, w2b, preferred_element_type=jnp.float32) + params["b2"], 0.0
    ).astype(jnp.bfloat16)
    ref = jnp.dot(ref, w3b, preferred_element_type=jnp.float32) + params["b3s"][0]

    assert out.shape == (batch, num_of_classes)
    assert jnp.allclose(out, ref, atol=2e-2, rtol=2e-2), (
        f"max abs diff {jnp.max(jnp.abs(out - ref))}")

    print("KERNEL_OK")
</pallas_src>

<mosaic_0001>
module attributes {stable_mosaic.version = 11 : i64} {
  func.func @_mlp_kernel(%arg0: i32, %arg1: memref<8x256xbf16, #tpu.memory_space<vmem>>, %arg2: memref<256x128xbf16, #tpu.memory_space<vmem>>, %arg3: memref<1x128xf32, #tpu.memory_space<vmem>>, %arg4: memref<128x128xbf16, #tpu.memory_space<vmem>>, %arg5: memref<1x128xf32, #tpu.memory_space<vmem>>, %arg6: memref<128x128xbf16, #tpu.memory_space<vmem>>, %arg7: memref<1x128xf32, #tpu.memory_space<vmem>>, %arg8: memref<8x128xf32, #tpu.memory_space<vmem>>) attributes {dimension_semantics = [#tpu.dimension_semantics<parallel>], iteration_bounds = array<i64: 1>, scalar_prefetch = 0 : i64, scratch_operands = 0 : i64, tpu.core_type = #tpu.core_type<tc>, window_params = [{transform_indices = @transform_0, window_bounds = array<i64: 8, 256>}, {pipeline_mode = #tpu.pipeline_mode<synchronous>, transform_indices = @transform_1, window_bounds = array<i64: 256, 128>}, {pipeline_mode = #tpu.pipeline_mode<synchronous>, transform_indices = @transform_2, window_bounds = array<i64: 1, 128>}, {pipeline_mode = #tpu.pipeline_mode<synchronous>, transform_indices = @transform_3, window_bounds = array<i64: 128, 128>}, {pipeline_mode = #tpu.pipeline_mode<synchronous>, transform_indices = @transform_4, window_bounds = array<i64: 1, 128>}, {pipeline_mode = #tpu.pipeline_mode<synchronous>, transform_indices = @transform_5, window_bounds = array<i64: 128, 128>}, {pipeline_mode = #tpu.pipeline_mode<synchronous>, transform_indices = @transform_6, window_bounds = array<i64: 1, 128>}, {transform_indices = @transform_7, window_bounds = array<i64: 8, 128>}]} {
    %c0 = arith.constant 0 : index
    %c0_0 = arith.constant 0 : index
    %0 = vector.load %arg1[%c0, %c0_0] : memref<8x256xbf16, #tpu.memory_space<vmem>>, vector<8x256xbf16>
    %c0_1 = arith.constant 0 : index
    %c0_2 = arith.constant 0 : index
    %1 = vector.load %arg2[%c0_1, %c0_2] : memref<256x128xbf16, #tpu.memory_space<vmem>>, vector<256x128xbf16>
    %cst = arith.constant dense<0.000000e+00> : vector<8x128xf32>
    %2 = tpu.matmul %0, %1, %cst {dimension_numbers = #tpu.dot_dimension_numbers<[1], [0], [0], [1], [0, 0, 1, 1], [], []>} : vector<8x256xbf16>, vector<256x128xbf16>, vector<8x128xf32> -> vector<8x128xf32>
    %c0_3 = arith.constant 0 : index
    %c0_4 = arith.constant 0 : index
    %3 = vector.load %arg3[%c0_3, %c0_4] : memref<1x128xf32, #tpu.memory_space<vmem>>, vector<1x128xf32>
    %4 = vector.broadcast %3 : vector<1x128xf32> to vector<8x128xf32>
    %5 = arith.addf %2, %4 : vector<8x128xf32>
    %cst_5 = arith.constant 0.000000e+00 : f32
    %6 = vector.broadcast %cst_5 : f32 to vector<8x128xf32>
    %7 = arith.maximumf %5, %6 : vector<8x128xf32>
    %8 = arith.truncf %7 : vector<8x128xf32> to vector<8x128xbf16>
    %c0_6 = arith.constant 0 : index
    %c0_7 = arith.constant 0 : index
    %9 = vector.load %arg4[%c0_6, %c0_7] : memref<128x128xbf16, #tpu.memory_space<vmem>>, vector<128x128xbf16>
    %cst_8 = arith.constant dense<0.000000e+00> : vector<8x128xf32>
    %10 = tpu.matmul %8, %9, %cst_8 {dimension_numbers = #tpu.dot_dimension_numbers<[1], [0], [0], [1], [0, 0, 1, 1], [], []>} : vector<8x128xbf16>, vector<128x128xbf16>, vector<8x128xf32> -> vector<8x128xf32>
    %c0_9 = arith.constant 0 : index
    %c0_10 = arith.constant 0 : index
    %11 = vector.load %arg5[%c0_9, %c0_10] : memref<1x128xf32, #tpu.memory_space<vmem>>, vector<1x128xf32>
    %12 = vector.broadcast %11 : vector<1x128xf32> to vector<8x128xf32>
    %13 = arith.addf %10, %12 : vector<8x128xf32>
    %cst_11 = arith.constant 0.000000e+00 : f32
    %14 = vector.broadcast %cst_11 : f32 to vector<8x128xf32>
    %15 = arith.maximumf %13, %14 : vector<8x128xf32>
    %16 = arith.truncf %15 : vector<8x128xf32> to vector<8x128xbf16>
    %c0_12 = arith.constant 0 : index
    %c0_13 = arith.constant 0 : index
    %17 = vector.load %arg6[%c0_12, %c0_13] : memref<128x128xbf16, #tpu.memory_space<vmem>>, vector<128x128xbf16>
    %cst_14 = arith.constant dense<0.000000e+00> : vector<8x128xf32>
    %18 = tpu.matmul %16, %17, %cst_14 {dimension_numbers = #tpu.dot_dimension_numbers<[1], [0], [0], [1], [0, 0, 1, 1], [], []>} : vector<8x128xbf16>, vector<128x128xbf16>, vector<8x128xf32> -> vector<8x128xf32>
    %c0_15 = arith.constant 0 : index
    %c0_16 = arith.constant 0 : index
    %19 = vector.load %arg7[%c0_15, %c0_16] : memref<1x128xf32, #tpu.memory_space<vmem>>, vector<1x128xf32>
    %20 = vector.broadcast %19 : vector<1x128xf32> to vector<8x128xf32>
    %21 = arith.addf %18, %20 : vector<8x128xf32>
    %c0_17 = arith.constant 0 : index
    %c0_18 = arith.constant 0 : index
    %22 = vector.load %arg8[%c0_17, %c0_18] : memref<8x128xf32, #tpu.memory_space<vmem>>, vector<8x128xf32>
    tpu.vector_store %arg8[%c0_17, %c0_18], %21 {strides = array<i32>} : memref<8x128xf32, #tpu.memory_space<vmem>>, vector<8x128xf32>,
    return
  }
  func.func @transform_0(%arg0: i32) -> (i32, i32) {
    %c0_i32 = arith.constant 0 : i32
    %c0_i32_0 = arith.constant 0 : i32
    return %arg0, %c0_i32 : i32, i32
  }
  func.func @transform_1(%arg0: i32) -> (i32, i32) {
    %c0_i32 = arith.constant 0 : i32
    %c0_i32_0 = arith.constant 0 : i32
    %c0_i32_1 = arith.constant 0 : i32
    return %c0_i32, %c0_i32_0 : i32, i32
  }
  func.func @transform_2(%arg0: i32) -> (i32, i32) {
    %c0_i32 = arith.constant 0 : i32
    %c0_i32_0 = arith.constant 0 : i32
    %c0_i32_1 = arith.constant 0 : i32
    return %c0_i32, %c0_i32_0 : i32, i32
  }
  func.func @transform_3(%arg0: i32) -> (i32, i32) {
    %c0_i32 = arith.constant 0 : i32
    %c0_i32_0 = arith.constant 0 : i32
    %c0_i32_1 = arith.constant 0 : i32
    return %c0_i32, %c0_i32_0 : i32, i32
  }
  func.func @transform_4(%arg0: i32) -> (i32, i32) {
    %c0_i32 = arith.constant 0 : i32
    %c0_i32_0 = arith.constant 0 : i32
    %c0_i32_1 = arith.constant 0 : i32
    return %c0_i32, %c0_i32_0 : i32, i32
  }
  func.func @transform_5(%arg0: i32) -> (i32, i32) {
    %c0_i32 = arith.constant 0 : i32
    %c0_i32_0 = arith.constant 0 : i32
    %c0_i32_1 = arith.constant 0 : i32
    return %c0_i32, %c0_i32_0 : i32, i32
  }
  func.func @transform_6(%arg0: i32) -> (i32, i32) {
    %c0_i32 = arith.constant 0 : i32
    %c0_i32_0 = arith.constant 0 : i32
    %c0_i32_1 = arith.constant 0 : i32
    return %c0_i32, %c0_i32_0 : i32, i32
  }
  func.func @transform_7(%arg0: i32) -> (i32, i32) {
    %c0_i32 = arith.constant 0 : i32
    %c0_i32_0 = arith.constant 0 : i32
    return %arg0, %c0_i32 : i32, i32
  }
}

</mosaic_0001>

<bundles_post_ra>
// kernel: tpu_custom_call.1
= control target key start
LH: loop header
LB: loop body
LE: loop exit
PB: predicated region body
PF: predicated region fallthrough
CT: control target
= control target key end

     0   :  { %12 = vsyncpa [#allocation3], 0  ;;  %s809_s0 = inlined_call_operand.hbm [shape: bf16[8,256], index: 0, kind: input, shape index: {}]   ;;  %s810_s1 = inlined_call_operand.hbm [shape: bf16[256,128], index: 1, kind: input, shape index: {}]   ;;  %s811_s2 = inlined_call_operand.vmem [shape: f32[1,128], index: 2, kind: input, shape index: {}]   ;;  %s812_s3 = inlined_call_operand.hbm [shape: bf16[128,128], index: 3, kind: input, shape index: {}]   ;;  %s813_s4 = inlined_call_operand.vmem [shape: f32[1,128], index: 4, kind: input, shape index: {}]   ;;  %s814_s5 = inlined_call_operand.hbm [shape: bf16[128,128], index: 5, kind: input, shape index: {}]   ;;  %s815_s6 = inlined_call_operand.vmem [shape: f32[1,128], index: 6, kind: input, shape index: {}]   ;;  %s816_s7 = inlined_call_operand.hbm [shape: f32[8,128], index: 7, kind: output, shape index: {}]  }
   0x1   :  { %13 = vsyncpa [#allocation6], 0 }
   0x2   :  { %14 = vsyncpa [#allocation9], 0  ;;  %s31_s26 = sshll.u32 %s810_s1, 4  ;;  %s32_s26 = int_to_ptr.hbm [resolvable:$true] %s31_s26 }
   0x3   :  { %15 = vsyncpa [#allocation4], 0  ;;  %s738_s27 = smov [#allocation5]   ;;  %s21_s8 = sshll.u32 %s809_s0, 4  ;;  %s22_s8 = int_to_ptr.hbm [resolvable:$true] %s21_s8 }
   0x4   :  { %s33_s28 = sshll.u32 %s738_s27, 4  ;;  %s739_s9 = smov 64   ;;  %s34_s28 = int_to_ptr.vmem [resolvable:$true] %s33_s28 }
   0x5   :  { %s740_s10 = smov 4   ;;  %s741_s11 = smov [#allocation2]  }
   0x6   :  { %39 = dma.hbm_to_vmem [thread:$0]  %s32_s26, 2048, %s34_s28, [#allocation6], %s739_s9, %s739_s9, %s740_s10  }
   0x7   :  { %s23_s12 = sshll.u32 %s741_s11, 4  ;;  %s46_s15 = sshll.u32 %s812_s3, 4  ;;  %s24_s12 = int_to_ptr.vmem [resolvable:$true] %s23_s12  ;;  %s47_s15 = int_to_ptr.hbm [resolvable:$true] %s46_s15 }
   0x8   :  { %26 = dma.hbm_to_vmem [thread:$0]  %s22_s8, 128, %s24_s12, [#allocation3]  }
   0x9   :  { %s61_s17 = sshll.u32 %s814_s5, 4  ;;  %s742_s18 = smov [#allocation7]   ;;  %s62_s17 = int_to_ptr.hbm [resolvable:$true] %s61_s17 }
   0xa   :  { %s48_s19 = sshll.u32 %s742_s18, 4  ;;  %s743_s0 = smov [#allocation8]   ;;  %s49_s19 = int_to_ptr.vmem [resolvable:$true] %s48_s19 }
   0xb   :  { %54 = dma.hbm_to_vmem [thread:$0]  %s47_s15, 1024, %s49_s19, [#allocation6], %s739_s9, %s739_s9, %s740_s10  }
   0xc   :  { %s63_s20 = sshll.u32 %s743_s0, 4  ;;  %s64_s20 = int_to_ptr.vmem [resolvable:$true] %s63_s20 }
   0xd   :  { %69 = dma.hbm_to_vmem [thread:$0]  %s62_s17, 1024, %s64_s20, [#allocation9], %s739_s9, %s739_s9, %s740_s10  }
   0xe   :  { %730 = dma.done.wait [#allocation3], 128  }
   0xf   :  { %731 = vsyncadd [#allocation3], 4294967168 }
  0x10   :  { %732 = dma.done.wait [#allocation6], 3072  }
  0x11   :  { %733 = vsyncadd [#allocation6], 4294964224 }
  0x12   :  { %734 = dma.done.wait [#allocation9], 1024  }
  0x13   :  { %735 = vsyncadd [#allocation9], 4294966272  ;;  %v575_v0 = vld [vmem:[#allocation5 + $0x38] sm:$0xff]  ;;  %v574_v2 = vld [vmem:[#allocation5 + $0x30] sm:$0xff]  ;;  %s744_s24 = smov [#allocation10]   ;;  %s428_s28 = sshll.u32 %s816_s7, 4  ;;  %s429_s28 = int_to_ptr.hbm [resolvable:$true] %s428_s28 }
  0x14   :  { %v583_v1 = vld [vmem:[#allocation5 + $0x78] sm:$0xff]  ;;  %228 = vmatpush.bf16.msra.mxu0 %v575_v0  ;;  %v582_v3 = vld [vmem:[#allocation5 + $0x70] sm:$0xff]  ;;  %v573_v5 = vld [vmem:[#allocation5 + $0x28] sm:$0xff]  ;;  %s426_s25 = sshll.u32 %s744_s24, 4  ;;  %s427_s25 = int_to_ptr.vmem [resolvable:$true] %s426_s25 }
  0x15   :  { %241 = vmatpush.bf16.msra.mxu1 %v583_v1  ;;  %v591_v4 = vld [vmem:[#allocation7 + $0x38] sm:$0xff]  ;;  %v581_v6 = vld [vmem:[#allocation5 + $0x68] sm:$0xff]  ;;  %v590_v7 = vld [vmem:[#allocation7 + $0x30] sm:$0xff] }
  0x16   :  { %324 = vmatpush.bf16.msra.mxu2 %v591_v4  ;;  %v572_v8 = vld [vmem:[#allocation5 + $0x20] sm:$0xff]  ;;  %v589_v10 = vld [vmem:[#allocation7 + $0x28] sm:$0xff]  ;;  %v571_v11 = vld [vmem:[#allocation5 + $0x18] sm:$0xff] }
  0x17   :  { %v580_v9 = vld [vmem:[#allocation5 + $0x60] sm:$0xff]  ;;  %v579_v12 = vld [vmem:[#allocation5 + $0x58] sm:$0xff]  ;;  %v570_v14 = vld [vmem:[#allocation5 + $0x10] sm:$0xff] }
  0x18   :  { %229 = vmatpush.bf16.msra.mxu0 %v574_v2  ;;  %v588_v13 = vld [vmem:[#allocation7 + $0x20] sm:$0xff]  ;;  %v578_v15 = vld [vmem:[#allocation5 + $0x50] sm:$0xff]  ;;  %v587_v16 = vld [vmem:[#allocation7 + $0x18] sm:$0xff] }
  0x19   :  { %242 = vmatpush.bf16.msra.mxu1 %v582_v3  ;;  %v569_v17 = vld [vmem:[#allocation5 + $0x8] sm:$0xff]  ;;  %v88_v19 = vld [vmem:[#allocation2] sm:$0xff]  ;;  %v586_v20 = vld [vmem:[#allocation7 + $0x10] sm:$0xff] }
  0x1a   :  { %325 = vmatpush.bf16.msra.mxu2 %v590_v7  ;;  %v577_v18 = vld [vmem:[#allocation5 + $0x48] sm:$0xff]  ;;  %v126_v21 = vunpack.c.l.b16 %v88_v19  ;;  %v127_v22 = vunpack.c.h.b16 %v88_v19  ;;  %v568_v23 = vld [vmem:[#allocation5] sm:$0xff]  ;;  %v599_v29 = vld [vmem:[#allocation8 + $0x38] sm:$0xff] }
  0x1b   :  { %v576_v24 = vld [vmem:[#allocation5 + $0x40] sm:$0xff]  ;;  %v585_v27 = vld [vmem:[#allocation7 + $0x8] sm:$0xff]  ;;  %407 = vmatpush.bf16.msra.mxu3 %v599_v29  ;;  %v598_v30 = vld [vmem:[#allocation8 + $0x30] sm:$0xff] }
  0x1c   :  { %230 = vmatpush.bf16.msra.mxu0 %v573_v5  ;;  %v128_v25 = vpack.c.b16 %v126_v21, %v126_v21  ;;  %v129_v26 = vpack.c.b16 %v127_v22, %v127_v22  ;;  %v584_v28 = vld [vmem:[#allocation7] sm:$0xff]  ;;  %v597_v31 = vld [vmem:[#allocation8 + $0x28] sm:$0xff]  ;;  %v595_v33 = vld [vmem:[#allocation8 + $0x18] sm:$0xff] }
  0x1d   :  { %243 = vmatpush.bf16.msra.mxu1 %v581_v6  ;;  %v596_v32 = vld [vmem:[#allocation8 + $0x20] sm:$0xff]  ;;  %v594_v34 = vld [vmem:[#allocation8 + $0x10] sm:$0xff]  ;;  %v607_v35 = vld [vmem:[%s811_s2] ss:$0 sm:$0xff] }
  0x1e   :  { %326 = vmatpush.bf16.msra.mxu2 %v589_v10  ;;  %v593_v44 = vld [vmem:[#allocation8 + $0x8] sm:$0xff]  ;;  %v592_v45 = vld [vmem:[#allocation8] sm:$0xff]  ;;  %v608_v46 = vld [vmem:[%s813_s4] ss:$0 sm:$0xff] }
  0x1f   :  { %408 = vmatpush.bf16.msra.mxu3 %v598_v30  ;;  %v609_v52 = vld [vmem:[%s815_s6] ss:$0 sm:$0xff] }
  0x20   :  { %231 = vmatpush.bf16.msra.mxu0 %v572_v8 }
  0x21   :  { %244 = vmatpush.bf16.msra.mxu1 %v580_v9 }
  0x22   :  { %327 = vmatpush.bf16.msra.mxu2 %v588_v13 }
  0x23   :  { %409 = vmatpush.bf16.msra.mxu3 %v597_v31 }
  0x24   :  { %232 = vmatpush.bf16.msra.mxu0 %v571_v11 }
  0x25   :  { %245 = vmatpush.bf16.msra.mxu1 %v579_v12 }
  0x26   :  { %328 = vmatpush.bf16.msra.mxu2 %v587_v16 }
  0x27   :  { %410 = vmatpush.bf16.msra.mxu3 %v596_v32 }
  0x28   :  { %233 = vmatpush.bf16.msra.mxu0 %v570_v14 }
  0x29   :  { %246 = vmatpush.bf16.msra.mxu1 %v578_v15 }
  0x2a   :  { %329 = vmatpush.bf16.msra.mxu2 %v586_v20 }
  0x2b   :  { %411 = vmatpush.bf16.msra.mxu3 %v595_v33 }
  0x2c   :  { %234 = vmatpush.bf16.msra.mxu0 %v569_v17 }
  0x2d   :  { %247 = vmatpush.bf16.msra.mxu1 %v577_v18 }
  0x2e   :  { %330 = vmatpush.bf16.msra.mxu2 %v585_v27 }
  0x2f   :  { %412 = vmatpush.bf16.msra.mxu3 %v594_v34 }
  0x30   :  { %235 = vmatpush.bf16.msra.mxu0 %v568_v23 }
  0x31   :  { %248 = vmatpush.bf16.msra.mxu1 %v576_v24 }
  0x32   :  { %331 = vmatpush.bf16.msra.mxu2 %v584_v28 }
  0x33   :  { %236 = vmatmul.bf16.vlgmr.msra.gmra.mxu0 %v128_v25  ;;  %413 = vmatpush.bf16.msra.mxu3 %v593_v44 }
  0x34   :  { %249 = vmatmul.bf16.vlgmr.msra.gmra.mxu1 %v129_v26 }
  0x37   :  { %414 = vmatpush.bf16.msra.mxu3 %v592_v45 }
  0xb0   :  { %v237_v36 = vpop.f32.mrf.mxu0 }
  0xb1   :  { %v250_v37 = vpop.f32.mrf.mxu1  ;;  %v238_v38 = vadd.f32 %v607_v35, %v237_v36 }
  0xb3   :  { %v251_v39 = vadd.f32 %v250_v37, %v238_v38 }
  0xb5   :  { %v254_v40 = vmax.f32 %v251_v39, 0.0 }
  0xb7   :  { %v255_v41 = vpack.c.bf16 %v254_v40, %v254_v40 }
  0xb8   :  { %v239_v42 = vpop.f32.mrf.mxu0 }
  0xb9   :  { %v252_v43 = vpop.f32.mrf.mxu1  ;;  %332 = vmatmul.bf16.vlgmr.msra.gmra.mxu2 %v255_v41 }
 0x13c   :  { %v333_v47 = vpop.f32.mrf.mxu2 }
 0x13d   :  { %v334_v48 = vadd.f32 %v608_v46, %v333_v47 }
 0x13f   :  { %v337_v49 = vmax.f32 %v334_v48, 0.0 }
 0x141   :  { %v338_v50 = vpack.c.bf16 %v337_v49, %v337_v49 }
 0x143   :  { %415 = vmatmul.bf16.vlgmr.msra.gmra.mxu3 %v338_v50 }
 0x144   :  { %v335_v51 = vpop.f32.mrf.mxu2 }
 0x1c6   :  { %v416_v53 = vpop.f32.mrf.mxu3 }
 0x1c7   :  { %v417_v54 = vadd.f32 %v609_v52, %v416_v53 }
 0x1c9   :  { %420 = vst [vmem:[#allocation10] sm:$0xff] %v417_v54 }
 0x1ca   :  { %431 = dma.vmem_to_hbm [thread:$0]  %s427_s25, 128, %s429_s28, [#allocation4]  }
 0x1ce   :  { %v418_v55 = vpop.f32.mrf.mxu3 }
 0x1cf   :  { %736 = dma.done.wait [#allocation4], 128  }
 0x1d0   :  { %737 = vsyncadd [#allocation4], 4294967168 }
 0x1d1   :  { %436 = vsyncpa [#allocation3], 1 }
 0x1d2   :  { %437 = vsyncpa [#allocation6], 1 }
 0x1d3   :  { %438 = vsyncpa [#allocation9], 1 }
 0x1d4   :  { %439 = vsyncpa [#allocation4], 1 }

</bundles_post_ra>
